<compile_context>
chip_gen: v6e
topology: v6e:2x2x1
jax: 0.10.0
libtpu: 0.0.40
codegen_flags: <defaults>
</compile_context>

<pallas_src>
import math

import jax
import jax.numpy as jnp
from jax.experimental import pallas as pl
from jax.experimental.pallas import tpu as pltpu


_TARGET_CHUNK_BYTES = 8 * 1024 * 1024   # aim for >= ~8 MiB per DMA chunk
_MAX_CHUNKS = 8                         # cap on concurrent DMAs (per-chunk sems)


def _sublane_pack(dtype):
    """Sublane packing factor for the dtype (rows per vreg tile)."""
    return {4: 8, 2: 16, 1: 32}.get(jnp.dtype(dtype).itemsize, 8)


def _leading_axis_chunks(shape, dtype):
    """Static (start, size) chunks along axis 0; contiguous and layout-aligned."""
    rows = shape[0]
    row_elems = math.prod(shape[1:]) if len(shape) > 1 else 1
    total_bytes = rows * row_elems * jnp.dtype(dtype).itemsize

    if len(shape) == 1:
        # Axis 0 is the lane (minormost) axis: keep it as one whole-array DMA
        # rather than risk non-lane-aligned sub-slices.
        return [(0, rows)]

    n = max(1, min(_MAX_CHUNKS, total_bytes // _TARGET_CHUNK_BYTES, rows))
    per = -(-rows // n)  # ceil division
    if len(shape) == 2:
        # Axis 0 is the sublane axis: keep chunk starts sublane-aligned so
        # every DMA (except possibly the ragged tail) is tile-aligned.
        sl = _sublane_pack(dtype)
        per = -(-per // sl) * sl

    chunks = []
    start = 0
    while start < rows:
        size = min(per, rows - start)
        chunks.append((start, size))
        start += size
    return chunks


def _make_dma_copy_kernel(chunks, ndim):
    """Kernel body: start all chunk DMAs (HBM -> HBM), then wait on all."""
    trailing = (slice(None),) * (ndim - 1)
    whole_array = len(chunks) == 1

    def kernel(x_ref, o_ref, sem_ref):
        copies = []
        if whole_array:
            copies.append(pltpu.make_async_copy(x_ref, o_ref, sem_ref.at[0]))
        else:
            for i, (start, size) in enumerate(chunks):
                idx = (pl.ds(start, size),) + trailing
                copies.append(
                    pltpu.make_async_copy(x_ref.at[idx], o_ref.at[idx],
                                          sem_ref.at[i]))
        for cp in copies:    # issue every DMA before waiting -> engines overlap
            cp.start()
        for cp in copies:
            cp.wait()

    return kernel


def _pallas_identity(x):
    """Pallas equivalent of TensorModule.forward: materialize the stored tensor."""
    orig_shape = x.shape
    dtype = x.dtype
    total = math.prod(orig_shape) if orig_shape else 1

    if total == 0:
        # Degenerate zero-sized tensor: nothing to copy.
        return jnp.zeros(orig_shape, dtype)

    # 0-d tensors get a trivial 1-element leading axis for the DMA.
    x_work = x.reshape(1) if x.ndim == 0 else x

    chunks = _leading_axis_chunks(x_work.shape, dtype)
    kernel = _make_dma_copy_kernel(chunks, x_work.ndim)
    itemsize = jnp.dtype(dtype).itemsize

    out = pl.pallas_call(
        kernel,
        out_shape=jax.ShapeDtypeStruct(x_work.shape, dtype),
        in_specs=[pl.BlockSpec(memory_space=pl.ANY)],   # raw HBM ref, no auto-DMA
        out_specs=pl.BlockSpec(memory_space=pl.ANY),    # output stays in HBM
        scratch_shapes=[pltpu.SemaphoreType.DMA((len(chunks),))],
        cost_estimate=pl.CostEstimate(
            flops=0, transcendentals=0, bytes_accessed=2 * total * itemsize),
    )(x_work)

    return out.reshape(orig_shape) if out.shape != orig_shape else out


class TensorModuleJax:
    """Holds a fixed tensor; forward always returns it (via the Pallas kernel)."""

    def __init__(self, x):
        self.x = jnp.asarray(x)  # detached-copy semantics: plain array
        self._forward = jax.jit(_pallas_identity)

    def __call__(self, *args, **kwargs):
        # Forward args/kwargs are ignored, exactly like the PyTorch module.
        return self._forward(self.x)


if __name__ == "__main__":
    key = jax.random.PRNGKey(0)
    # Deterministic "parameter" tensor passed at init (NCHW-like shape).
    x_init = jax.random.normal(key, (2, 4, 16, 16), dtype=jnp.float32)

    module = TensorModuleJax(x_init)

    dummy_arg = jnp.ones((3, 5), dtype=jnp.float32)
    out = module(dummy_arg, some_kwarg=42)
    out = jax.block_until_ready(out)

    assert out.shape == x_init.shape
    assert out.dtype == x_init.dtype
    # Result must be bit-identical (pure copy), so array_equal not allclose.
    assert bool(jnp.array_equal(out, x_init))

    print("KERNEL_OK")
</pallas_src>

<mosaic_0001>
module attributes {stable_mosaic.version = 11 : i64} {
  func.func @kernel(%arg0: memref<2x4x16x16xf32, #tpu.memory_space<any>>, %arg1: memref<2x4x16x16xf32, #tpu.memory_space<any>>, %arg2: memref<1x!tpu.dma_semaphore, #tpu.memory_space<semaphore_mem>>) attributes {dimension_semantics = [], scalar_prefetch = 0 : i64, scratch_operands = 1 : i64, tpu.core_type = #tpu.core_type<tc>} {
    %c0_i32 = arith.constant 0 : i32
    %0 = tpu.memref_slice %arg2[%c0_i32] : memref<1x!tpu.dma_semaphore, #tpu.memory_space<semaphore_mem>> -> memref<1x!tpu.dma_semaphore, #tpu.memory_space<semaphore_mem>>
    %1 = tpu.memref_squeeze %0 : memref<1x!tpu.dma_semaphore, #tpu.memory_space<semaphore_mem>> -> memref<!tpu.dma_semaphore, #tpu.memory_space<semaphore_mem>>
    tpu.enqueue_dma source(%arg0 : memref<2x4x16x16xf32, #tpu.memory_space<any>>) target(%arg1 : memref<2x4x16x16xf32, #tpu.memory_space<any>>) target_semaphore(%1 : memref<!tpu.dma_semaphore, #tpu.memory_space<semaphore_mem>>)
    %c0_i32_0 = arith.constant 0 : i32
    %2 = tpu.memref_slice %arg2[%c0_i32_0] : memref<1x!tpu.dma_semaphore, #tpu.memory_space<semaphore_mem>> -> memref<1x!tpu.dma_semaphore, #tpu.memory_space<semaphore_mem>>
    %3 = tpu.memref_squeeze %2 : memref<1x!tpu.dma_semaphore, #tpu.memory_space<semaphore_mem>> -> memref<!tpu.dma_semaphore, #tpu.memory_space<semaphore_mem>>
    tpu.wait_dma2 semaphore(%3 : memref<!tpu.dma_semaphore, #tpu.memory_space<semaphore_mem>>) src(%arg0 : memref<2x4x16x16xf32, #tpu.memory_space<any>>) dst(%arg1 : memref<2x4x16x16xf32, #tpu.memory_space<any>>)
    return
  }
}

</mosaic_0001>

<bundles_post_ra>
// kernel: _pallas_identity.1
= control target key start
LH: loop header
LB: loop body
LE: loop exit
PB: predicated region body
PF: predicated region fallthrough
CT: control target
= control target key end

     0   :  { %s30_s6 = smov [#allocation2]   ;;  %s31_s7 = smov 131072   ;;  %s49_s0 = inlined_call_operand.hbm [shape: f32[2,4,16,16], index: 0, kind: input, shape index: {}]   ;;  %s50_s1 = inlined_call_operand.hbm [shape: f32[2,4,16,16], index: 1, kind: output, shape index: {}]  }
   0x1   :  { %s32_s8 = smov 0  }
   0x2   :  { %12 = dma.general %s49_s0, 2048, %s50_s1, %s30_s6, %s31_s7, [#allocation4], %s32_s8, 0  }
   0x3   :  { %28 = dma.done.wait [#allocation2], 2048 }
   0x4   :  { %29 = vsyncadd [#allocation2], 4294965248 }
   0x5   :  { %18 = vsyncmov [#allocation2] }
   0x8   :  { %s19_s13 = vpop.sfrf %18 }
   0x9   :  { %p24_p0 = scmp.ne.s32.totalorder %s19_s13, 0 }
   0xb   :  { %23 = shalt.err (%p24_p0)  }

</bundles_post_ra>
